<compile_context>
chip_gen: v5e
topology: v5e:2x2
jax: 0.10.0
libtpu: 0.0.40
codegen_flags: <defaults>
</compile_context>

<pallas_src>
import functools

import jax
import jax.numpy as jnp
from jax.experimental import pallas as pl
from jax.experimental.pallas import tpu as pltpu


def _round_up(n: int, m: int) -> int:
    return (n + m - 1) // m * m


def geu_kernel(x_ref, w1_ref, b1_ref, w2_ref, b2_ref, o_ref, acc_ref):
    k = pl.program_id(1)

    @pl.when(k == 0)
    def _init():
        acc_ref[...] = jnp.zeros_like(acc_ref)

    # fc: partial product of x @ W1 over this K tile.  Operands are bf16 on the
    # fast path (cast in the wrapper) -> bf16 MXU rate; accumulation is f32.
    acc_ref[...] += jnp.dot(x_ref[...], w1_ref[...],
                            preferred_element_type=jnp.float32)

    @pl.when(k == pl.num_programs(1) - 1)
    def _finalize():
        y = acc_ref[...] + b1_ref[...]                      # f32
        # Context_Gating.fc.  Feeding the MXU in w2's dtype is the bf16 fast
        # path; this intentionally rounds y to bf16 for the second matmul only
        # (the f32 y is kept for the GLU multiply and the norm).
        z = jnp.dot(y.astype(w2_ref.dtype), w2_ref[...],
                    preferred_element_type=jnp.float32) + b2_ref[...]
        # GLU(cat(y, z), dim=1) == y * sigmoid(z)
        # TODO(synk): if bundle dumps show the single EUP binding for small
        # D_in, compute the sigmoid in bf16 on v6e/v7x (not v5e).
        g = y * jax.nn.sigmoid(z)
        # F.normalize(dim=1): g / max(||g||, 1e-12) == g * rsqrt(max(sumsq, 1e-24))
        sumsq = jnp.sum(g * g, axis=-1, keepdims=True)
        o_ref[...] = (g * jax.lax.rsqrt(jnp.maximum(sumsq, 1e-24))).astype(o_ref.dtype)


def _vmem_bytes(tile_b, k_tile, num_k, d_out_p, x_bytes, w_bytes, out_bytes):
    """Rough VMEM footprint for the chosen tiling (used to size tile_b / limit)."""
    x_buf = 2 * tile_b * k_tile * x_bytes                     # double-buffered x tile
    w1_buf = (2 if num_k > 1 else 1) * k_tile * d_out_p * w_bytes
    w2_buf = d_out_p * d_out_p * w_bytes                      # single-buffered
    bias = 2 * d_out_p * 4                                    # b1, b2 (f32)
    out_buf = 2 * tile_b * d_out_p * out_bytes                # double-buffered out tile
    acc = tile_b * d_out_p * 4                                # f32 accumulator scratch
    temps = 3 * tile_b * d_out_p * 4                          # y / z / g f32 temporaries
    return x_buf + w1_buf + w2_buf + bias + out_buf + acc + temps


def _spec(shape, index_map, resident):
    """BlockSpec; invariant operands are single-buffered (no double-buffer DMA)."""
    if not resident:
        return pl.BlockSpec(shape, index_map)
    try:
        return pl.BlockSpec(shape, index_map, pipeline_mode=pl.Buffered(1))
    except Exception:  # graceful fallback to default buffering
        return pl.BlockSpec(shape, index_map)


@functools.partial(
    jax.jit,
    static_argnames=("tile_b", "use_bf16", "out_dtype", "vmem_limit_bytes", "max_k_tile"),
)
def gated_embedding_unit(x, w1, b1, w2, b2, *, tile_b=None, use_bf16=True,
                         out_dtype=None, vmem_limit_bytes=None, max_k_tile=None):
    """x: (B, D_in); w1: (D_in, D_out); b1: (1, D_out); w2: (D_out, D_out); b2: (1, D_out).

    use_bf16=True (default) casts x/w1/w2 to bf16 for the MXU (f32 accumulation,
    f32 biases and epilogue).  Set use_bf16=False for an exact f32 path.
    """
    B, D_in = x.shape
    D_out = w1.shape[1]
    out_dtype = x.dtype if out_dtype is None else out_dtype

    w_dtype = jnp.bfloat16 if use_bf16 else jnp.float32
    x_mm_dtype = jnp.bfloat16 if use_bf16 else x.dtype
    x_bytes = jnp.dtype(x_mm_dtype).itemsize
    w_bytes = jnp.dtype(w_dtype).itemsize
    out_bytes = jnp.dtype(out_dtype).itemsize

    # Lane-dense feature dims (multiples of 128); pad only when needed.
    d_out_p = _round_up(D_out, 128)
    d_in_p0 = _round_up(D_in, 128)

    # Generation-aware VMEM budget (v5e/v6e: 128 MiB phys, v7x: 64 MiB per TC).
    try:
        vmem_cap = int(pltpu.get_tpu_info().vmem_capacity_bytes)
    except Exception:
        vmem_cap = 64 << 20  # conservative default (v7x per-TensorCore)
    budget = min(100 << 20, vmem_cap * 3 // 4)

    # --- K tiling of the first matmul (P3) when the weights would not fit. ---
    w2_tot = d_out_p * d_out_p * w_bytes
    w1_tot = d_in_p0 * d_out_p * w_bytes
    weight_budget = max(min(vmem_cap // 4, 48 << 20),
                        w2_tot + 2 * 128 * d_out_p * w_bytes)
    k_cap = d_in_p0 if max_k_tile is None else min(d_in_p0, _round_up(max_k_tile, 128))
    if k_cap >= d_in_p0 and (w1_tot + w2_tot) <= weight_budget:
        k_tile = d_in_p0                                   # w1 fully resident
    else:
        avail = max(weight_budget - w2_tot, 2 * 128 * d_out_p * w_bytes)
        k_tile = min(k_cap, max(128, (avail // (2 * d_out_p * w_bytes)) // 128 * 128))
    d_in_p = _round_up(D_in, k_tile)                       # k_tile divides d_in_p
    num_k = d_in_p // k_tile

    # --- Batch tile: big enough to amortize per-step overhead, small enough to
    #     fit the VMEM budget, and >= 2 grid steps so both v7x TCs get work. ---
    tb = 512 if tile_b is None else max(8, _round_up(tile_b, 8))
    if B >= 16:
        tb = min(tb, _round_up((B + 1) // 2, 8))
    if tb >= B:
        tb = B                                             # full-dim block is legal
    while tb > 8 and _vmem_bytes(tb, k_tile, num_k, d_out_p,
                                 x_bytes, w_bytes, out_bytes) > budget:
        tb = max(8, _round_up(tb // 2, 8))

    est = _vmem_bytes(tb, k_tile, num_k, d_out_p, x_bytes, w_bytes, out_bytes)
    vmem_limit = (int(vmem_limit_bytes) if vmem_limit_bytes is not None
                  else int(min(max(est + (4 << 20), 16 << 20), max(budget, est))))

    # --- Cast + pad (feature dims only; no batch pad / batch slice). ---
    xk = x.astype(x_mm_dtype)
    if d_in_p != D_in:
        xk = jnp.pad(xk, ((0, 0), (0, d_in_p - D_in)))
    w1k = w1.astype(w_dtype)
    if d_in_p != D_in or d_out_p != D_out:
        w1k = jnp.pad(w1k, ((0, d_in_p - D_in), (0, d_out_p - D_out)))
    w2k = w2.astype(w_dtype)
    if d_out_p != D_out:
        w2k = jnp.pad(w2k, ((0, d_out_p - D_out), (0, d_out_p - D_out)))
    b1k = jnp.pad(jnp.reshape(b1, (1, D_out)).astype(jnp.float32),
                  ((0, 0), (0, d_out_p - D_out)))
    b2k = jnp.pad(jnp.reshape(b2, (1, D_out)).astype(jnp.float32),
                  ((0, 0), (0, d_out_p - D_out)))

    grid = (pl.cdiv(B, tb), num_k)

    # TODO(synk): for D_out large enough that w2 alone blows the weight budget,
    # add an output-N tiling axis as well (not needed for typical GEU sizes).
    out = pl.pallas_call(
        geu_kernel,
        out_shape=jax.ShapeDtypeStruct((B, d_out_p), out_dtype),
        grid=grid,
        in_specs=[
            _spec((tb, k_tile), lambda i, k: (i, k), resident=False),        # x
            _spec((k_tile, d_out_p), lambda i, k: (k, 0),
                  resident=(num_k == 1)),                                    # w1
            _spec((1, d_out_p), lambda i, k: (0, 0), resident=True),         # b1
            _spec((d_out_p, d_out_p), lambda i, k: (0, 0), resident=True),   # w2
            _spec((1, d_out_p), lambda i, k: (0, 0), resident=True),         # b2
        ],
        out_specs=pl.BlockSpec((tb, d_out_p), lambda i, k: (i, 0)),
        scratch_shapes=[pltpu.VMEM((tb, d_out_p), jnp.float32)],
        compiler_params=pltpu.CompilerParams(
            # Batch tiles independent -> parallel (2 TCs on v7x); K is a
            # reduction -> arbitrary, and it is the innermost grid axis.
            dimension_semantics=("parallel", "arbitrary"),
            vmem_limit_bytes=vmem_limit,
        ),
    )(xk, w1k, b1k, w2k, b2k)

    return out if d_out_p == D_out else out[:, :D_out]


def reference(x, w1, b1, w2, b2):
    hp = jax.lax.Precision.HIGHEST
    y = jnp.dot(x, w1, precision=hp) + b1
    z = jnp.dot(y, w2, precision=hp) + b2
    g = y * jax.nn.sigmoid(z)
    norm = jnp.sqrt(jnp.sum(g * g, axis=-1, keepdims=True))
    return g / jnp.maximum(norm, 1e-12)


if __name__ == "__main__":
    key = jax.random.PRNGKey(0)

    # --- Test 1: default bf16 MXU path (small GEU shapes). ---
    B, D_in, D_out = 8, 64, 32
    k_x, k_w1, k_b1, k_w2, k_b2 = jax.random.split(key, 5)
    x = jax.random.normal(k_x, (B, D_in), dtype=jnp.float32)
    lim1 = 1.0 / jnp.sqrt(D_in)
    lim2 = 1.0 / jnp.sqrt(D_out)
    w1 = jax.random.uniform(k_w1, (D_in, D_out), minval=-lim1, maxval=lim1, dtype=jnp.float32)
    b1 = jax.random.uniform(k_b1, (1, D_out), minval=-lim1, maxval=lim1, dtype=jnp.float32)
    w2 = jax.random.uniform(k_w2, (D_out, D_out), minval=-lim2, maxval=lim2, dtype=jnp.float32)
    b2 = jax.random.uniform(k_b2, (1, D_out), minval=-lim2, maxval=lim2, dtype=jnp.float32)

    ref = reference(x, w1, b1, w2, b2)

    out_fast = jax.block_until_ready(gated_embedding_unit(x, w1, b1, w2, b2))
    assert out_fast.shape == (B, D_out)
    assert jnp.allclose(out_fast, ref, atol=3e-2, rtol=3e-2), "bf16 path mismatch"

    # --- Test 2: exact f32 path. ---
    out_f32 = jax.block_until_ready(
        gated_embedding_unit(x, w1, b1, w2, b2, use_bf16=False))
    assert jnp.allclose(out_f32, ref, atol=2e-4, rtol=2e-4), "f32 path mismatch"

    # --- Test 3: K-tiled accumulator + ragged batch tail (grid=(3, 2)). ---
    B2, D_in2, D_out2 = 20, 256, 128
    k_x2, k_w12, k_b12, k_w22, k_b22 = jax.random.split(jax.random.PRNGKey(1), 5)
    x2 = jax.random.normal(k_x2, (B2, D_in2), dtype=jnp.float32)
    l1 = 1.0 / jnp.sqrt(D_in2)
    l2 = 1.0 / jnp.sqrt(D_out2)
    w12 = jax.random.uniform(k_w12, (D_in2, D_out2), minval=-l1, maxval=l1, dtype=jnp.float32)
    b12 = jax.random.uniform(k_b12, (1, D_out2), minval=-l1, maxval=l1, dtype=jnp.float32)
    w22 = jax.random.uniform(k_w22, (D_out2, D_out2), minval=-l2, maxval=l2, dtype=jnp.float32)
    b22 = jax.random.uniform(k_b22, (1, D_out2), minval=-l2, maxval=l2, dtype=jnp.float32)
    ref2 = reference(x2, w12, b12, w22, b22)
    out2 = jax.block_until_ready(
        gated_embedding_unit(x2, w12, b12, w22, b22,
                             use_bf16=False, tile_b=8, max_k_tile=128))
    assert out2.shape == (B2, D_out2)
    assert jnp.allclose(out2, ref2, atol=2e-4, rtol=2e-4), "K-tiled path mismatch"

    print("KERNEL_OK")
</pallas_src>

<mosaic_0001>
module attributes {stable_mosaic.version = 11 : i64} {
  func.func @geu_kernel(%arg0: i32, %arg1: i32, %arg2: memref<8x128xbf16, #tpu.memory_space<vmem>>, %arg3: memref<128x128xbf16, #tpu.memory_space<vmem>>, %arg4: memref<1x128xf32, #tpu.memory_space<vmem>>, %arg5: memref<128x128xbf16, #tpu.memory_space<vmem>>, %arg6: memref<1x128xf32, #tpu.memory_space<vmem>>, %arg7: memref<8x128xf32, #tpu.memory_space<vmem>>, %arg8: memref<8x128xf32, #tpu.memory_space<vmem>>) attributes {dimension_semantics = [#tpu.dimension_semantics<parallel>, #tpu.dimension_semantics<arbitrary>], iteration_bounds = array<i64: 1, 1>, scalar_prefetch = 0 : i64, scratch_operands = 1 : i64, tpu.core_type = #tpu.core_type<tc>, window_params = [{transform_indices = @transform_0, window_bounds = array<i64: 8, 128>}, {pipeline_mode = #tpu.pipeline_mode<synchronous>, transform_indices = @transform_1, window_bounds = array<i64: 128, 128>}, {pipeline_mode = #tpu.pipeline_mode<synchronous>, transform_indices = @transform_2, window_bounds = array<i64: 1, 128>}, {pipeline_mode = #tpu.pipeline_mode<synchronous>, transform_indices = @transform_3, window_bounds = array<i64: 128, 128>}, {pipeline_mode = #tpu.pipeline_mode<synchronous>, transform_indices = @transform_4, window_bounds = array<i64: 1, 128>}, {transform_indices = @transform_5, window_bounds = array<i64: 8, 128>}]} {
    %c0_i32 = arith.constant 0 : i32
    %0 = arith.cmpi eq, %arg1, %c0_i32 : i32
    %1 = arith.extui %0 : i1 to i32
    %c0_i32_0 = arith.constant 0 : i32
    %2 = arith.cmpi ne, %1, %c0_i32_0 : i32
    scf.if %2 {
      %cst_10 = arith.constant 0.000000e+00 : f32
      %12 = vector.broadcast %cst_10 : f32 to vector<8x128xf32>
      %c0_11 = arith.constant 0 : index
      %c0_12 = arith.constant 0 : index
      %13 = vector.load %arg8[%c0_11, %c0_12] : memref<8x128xf32, #tpu.memory_space<vmem>>, vector<8x128xf32>
      tpu.vector_store %arg8[%c0_11, %c0_12], %12 {strides = array<i32>} : memref<8x128xf32, #tpu.memory_space<vmem>>, vector<8x128xf32>,
    } else {
    }
    %c0 = arith.constant 0 : index
    %c0_1 = arith.constant 0 : index
    %3 = vector.load %arg8[%c0, %c0_1] : memref<8x128xf32, #tpu.memory_space<vmem>>, vector<8x128xf32>
    %c0_2 = arith.constant 0 : index
    %c0_3 = arith.constant 0 : index
    %4 = vector.load %arg2[%c0_2, %c0_3] : memref<8x128xbf16, #tpu.memory_space<vmem>>, vector<8x128xbf16>
    %c0_4 = arith.constant 0 : index
    %c0_5 = arith.constant 0 : index
    %5 = vector.load %arg3[%c0_4, %c0_5] : memref<128x128xbf16, #tpu.memory_space<vmem>>, vector<128x128xbf16>
    %cst = arith.constant dense<0.000000e+00> : vector<8x128xf32>
    %6 = tpu.matmul %4, %5, %cst {dimension_numbers = #tpu.dot_dimension_numbers<[1], [0], [0], [1], [0, 0, 1, 1], [], []>} : vector<8x128xbf16>, vector<128x128xbf16>, vector<8x128xf32> -> vector<8x128xf32>
    %7 = arith.addf %3, %6 : vector<8x128xf32>
    %c0_6 = arith.constant 0 : index
    %c0_7 = arith.constant 0 : index
    %8 = vector.load %arg8[%c0_6, %c0_7] : memref<8x128xf32, #tpu.memory_space<vmem>>, vector<8x128xf32>
    tpu.vector_store %arg8[%c0_6, %c0_7], %7 {strides = array<i32>} : memref<8x128xf32, #tpu.memory_space<vmem>>, vector<8x128xf32>,
    %c0_i32_8 = arith.constant 0 : i32
    %9 = arith.cmpi eq, %arg1, %c0_i32_8 : i32
    %10 = arith.extui %9 : i1 to i32
    %c0_i32_9 = arith.constant 0 : i32
    %11 = arith.cmpi ne, %10, %c0_i32_9 : i32
    scf.if %11 {
      %c0_10 = arith.constant 0 : index
      %c0_11 = arith.constant 0 : index
      %12 = vector.load %arg8[%c0_10, %c0_11] : memref<8x128xf32, #tpu.memory_space<vmem>>, vector<8x128xf32>
      %c0_12 = arith.constant 0 : index
      %c0_13 = arith.constant 0 : index
      %13 = vector.load %arg4[%c0_12, %c0_13] : memref<1x128xf32, #tpu.memory_space<vmem>>, vector<1x128xf32>
      %14 = vector.broadcast %13 : vector<1x128xf32> to vector<8x128xf32>
      %15 = arith.addf %12, %14 : vector<8x128xf32>
      %16 = arith.truncf %15 : vector<8x128xf32> to vector<8x128xbf16>
      %c0_14 = arith.constant 0 : index
      %c0_15 = arith.constant 0 : index
      %17 = vector.load %arg5[%c0_14, %c0_15] : memref<128x128xbf16, #tpu.memory_space<vmem>>, vector<128x128xbf16>
      %cst_16 = arith.constant dense<0.000000e+00> : vector<8x128xf32>
      %18 = tpu.matmul %16, %17, %cst_16 {dimension_numbers = #tpu.dot_dimension_numbers<[1], [0], [0], [1], [0, 0, 1, 1], [], []>} : vector<8x128xbf16>, vector<128x128xbf16>, vector<8x128xf32> -> vector<8x128xf32>
      %c0_17 = arith.constant 0 : index
      %c0_18 = arith.constant 0 : index
      %19 = vector.load %arg6[%c0_17, %c0_18] : memref<1x128xf32, #tpu.memory_space<vmem>>, vector<1x128xf32>
      %20 = vector.broadcast %19 : vector<1x128xf32> to vector<8x128xf32>
      %21 = arith.addf %18, %20 : vector<8x128xf32>
      %22 = arith.negf %21 : vector<8x128xf32>
      %23 = math.exp %22 : vector<8x128xf32>
      %cst_19 = arith.constant 1.000000e+00 : f32
      %24 = vector.broadcast %cst_19 : f32 to vector<8x128xf32>
      %25 = arith.addf %24, %23 : vector<8x128xf32>
      %26 = arith.divf %24, %25 : vector<8x128xf32>
      %27 = arith.mulf %15, %26 : vector<8x128xf32>
      %28 = arith.mulf %27, %27 : vector<8x128xf32>
      %cst_20 = arith.constant dense<0.000000e+00> : vector<8xf32>
      %29 = vector.multi_reduction <add>, %28, %cst_20 [1] : vector<8x128xf32> to vector<8xf32>
      %30 = vector.shape_cast %29 : vector<8xf32> to vector<8x1xf32>
      %cst_21 = arith.constant 1.000000e-24 : f32
      %31 = vector.broadcast %cst_21 : f32 to vector<8x1xf32>
      %32 = arith.maximumf %30, %31 : vector<8x1xf32>
      %33 = math.rsqrt %32 : vector<8x1xf32>
      %34 = vector.broadcast %33 : vector<8x1xf32> to vector<8x128xf32>
      %35 = arith.mulf %27, %34 : vector<8x128xf32>
      %c0_22 = arith.constant 0 : index
      %c0_23 = arith.constant 0 : index
      %36 = vector.load %arg7[%c0_22, %c0_23] : memref<8x128xf32, #tpu.memory_space<vmem>>, vector<8x128xf32>
      tpu.vector_store %arg7[%c0_22, %c0_23], %35 {strides = array<i32>} : memref<8x128xf32, #tpu.memory_space<vmem>>, vector<8x128xf32>,
    } else {
    }
    return
  }
  func.func @transform_0(%arg0: i32, %arg1: i32) -> (i32, i32) {
    %c0_i32 = arith.constant 0 : i32
    return %arg0, %arg1 : i32, i32
  }
  func.func @transform_1(%arg0: i32, %arg1: i32) -> (i32, i32) {
    %c0_i32 = arith.constant 0 : i32
    %c0_i32_0 = arith.constant 0 : i32
    return %arg1, %c0_i32 : i32, i32
  }
  func.func @transform_2(%arg0: i32, %arg1: i32) -> (i32, i32) {
    %c0_i32 = arith.constant 0 : i32
    %c0_i32_0 = arith.constant 0 : i32
    %c0_i32_1 = arith.constant 0 : i32
    return %c0_i32, %c0_i32_0 : i32, i32
  }
  func.func @transform_3(%arg0: i32, %arg1: i32) -> (i32, i32) {
    %c0_i32 = arith.constant 0 : i32
    %c0_i32_0 = arith.constant 0 : i32
    %c0_i32_1 = arith.constant 0 : i32
    return %c0_i32, %c0_i32_0 : i32, i32
  }
  func.func @transform_4(%arg0: i32, %arg1: i32) -> (i32, i32) {
    %c0_i32 = arith.constant 0 : i32
    %c0_i32_0 = arith.constant 0 : i32
    %c0_i32_1 = arith.constant 0 : i32
    return %c0_i32, %c0_i32_0 : i32, i32
  }
  func.func @transform_5(%arg0: i32, %arg1: i32) -> (i32, i32) {
    %c0_i32 = arith.constant 0 : i32
    %c0_i32_0 = arith.constant 0 : i32
    return %arg0, %c0_i32 : i32, i32
  }
}

</mosaic_0001>

<bundles_post_ra>
// kernel: gated_embedding_unit.1
= control target key start
LH: loop header
LB: loop body
LE: loop exit
PB: predicated region body
PF: predicated region fallthrough
CT: control target
= control target key end

     0   :  { %s457_s0 = inlined_call_operand.vmem [shape: bf16[8,128], index: 0, kind: input, shape index: {}]   ;;  %s458_s1 = inlined_call_operand.vmem [shape: bf16[128,128], index: 1, kind: input, shape index: {}]   ;;  %s459_s2 = inlined_call_operand.vmem [shape: f32[1,128], index: 2, kind: input, shape index: {}]   ;;  %s460_s3 = inlined_call_operand.vmem [shape: bf16[128,128], index: 3, kind: input, shape index: {}]   ;;  %s461_s4 = inlined_call_operand.vmem [shape: f32[1,128], index: 4, kind: input, shape index: {}]   ;;  %s462_s5 = inlined_call_operand.hbm [shape: f32[8,128], index: 5, kind: output, shape index: {}]  }
   0x1   :  { %v322_v0 = vld [vmem:[%s458_s1 + $0x38] sm:$0xff]  ;;  %v321_v1 = vld [vmem:[%s458_s1 + $0x30] sm:$0xff]  ;;  %v320_v4 = vld [vmem:[%s458_s1 + $0x28] sm:$0xff] }
   0x2   :  { %92 = vmatpush.bf16.msra.mxu0 %v322_v0  ;;  %v330_v2 = vld [vmem:[%s460_s3 + $0x38] sm:$0xff]  ;;  %v329_v3 = vld [vmem:[%s460_s3 + $0x30] sm:$0xff] }
   0x3   :  { %185 = vmatpush.bf16.msra.mxu1 %v330_v2 }
   0x6   :  { %93 = vmatpush.bf16.msra.mxu0 %v321_v1 }
   0x7   :  { %10 = vsyncpa [#allocation4], 0  ;;  %186 = vmatpush.bf16.msra.mxu1 %v329_v3  ;;  %v328_v5 = vld [vmem:[%s460_s3 + $0x28] sm:$0xff]  ;;  %v319_v6 = vld [vmem:[%s458_s1 + $0x20] sm:$0xff]  ;;  %s241_s30 = sshll.u32 %s462_s5, 4  ;;  %s242_s30 = int_to_ptr.hbm [resolvable:$true] %s241_s30 }
   0x8   :  { %v327_v7 = vld [vmem:[%s460_s3 + $0x20] sm:$0xff]  ;;  %v318_v8 = vld [vmem:[%s458_s1 + $0x18] sm:$0xff]  ;;  %v317_v10 = vld [vmem:[%s458_s1 + $0x10] sm:$0xff] }
   0x9   :  { %v326_v9 = vld [vmem:[%s460_s3 + $0x18] sm:$0xff]  ;;  %v325_v11 = vld [vmem:[%s460_s3 + $0x10] sm:$0xff]  ;;  %v316_v12 = vld [vmem:[%s458_s1 + $0x8] sm:$0xff] }
   0xa   :  { %94 = vmatpush.bf16.msra.mxu0 %v320_v4  ;;  %v324_v13 = vld [vmem:[%s460_s3 + $0x8] sm:$0xff]  ;;  %v315_v14 = vld [vmem:[%s458_s1] sm:$0xff] }
   0xb   :  { %187 = vmatpush.bf16.msra.mxu1 %v328_v5  ;;  %v27_v15 = vld [vmem:[%s457_s0] sm:$0xf]  ;;  %s366_s0 = smov [#allocation3]  }
   0xc   :  { %v323_v16 = vld [vmem:[%s460_s3] sm:$0xff] }
   0xd   :  { %v332_v17 = vld [vmem:[%s459_s2] ss:$0 sm:$0xff]  ;;  %s239_s2 = sshll.u32 %s366_s0, 4  ;;  %s240_s2 = int_to_ptr.vmem [resolvable:$true] %s239_s2 }
   0xe   :  { %95 = vmatpush.bf16.msra.mxu0 %v319_v6  ;;  %v333_v22 = vld [vmem:[%s461_s4] ss:$0 sm:$0xff] }
   0xf   :  { %188 = vmatpush.bf16.msra.mxu1 %v327_v7 }
  0x12   :  { %96 = vmatpush.bf16.msra.mxu0 %v318_v8 }
  0x13   :  { %189 = vmatpush.bf16.msra.mxu1 %v326_v9 }
  0x16   :  { %97 = vmatpush.bf16.msra.mxu0 %v317_v10 }
  0x17   :  { %190 = vmatpush.bf16.msra.mxu1 %v325_v11 }
  0x1a   :  { %98 = vmatpush.bf16.msra.mxu0 %v316_v12 }
  0x1b   :  { %191 = vmatpush.bf16.msra.mxu1 %v324_v13 }
  0x1e   :  { %99 = vmatpush.bf16.msra.mxu0 %v315_v14 }
  0x1f   :  { %192 = vmatpush.bf16.msra.mxu1 %v323_v16 }
  0x21   :  { %100 = vmatmul.bf16.vlgmr.msra.gmra.mxu0 %v27_v15 }
  0x9e   :  { %v101_v18 = vpop.f32.mrf.mxu0 }
  0x9f   :  { %v115_v19 = vadd.f32 %v332_v17, %v101_v18 }
  0xa1   :  { %v116_v20 = vpack.c.bf16 %v115_v19, %v115_v19 }
  0xa3   :  { %193 = vmatmul.bf16.vlgmr.msra.gmra.mxu1 %v116_v20 }
  0xa6   :  { %v103_v21 = vpop.f32.mrf.mxu0 }
 0x120   :  { %v194_v23 = vpop.f32.mrf.mxu1 }
 0x121   :  { %v195_v24 = vadd.f32 %v333_v22, %v194_v23 }
 0x123   :  { %v314_v25 = vmul.f32 -1.442695, %v195_v24 }
 0x125   :  { %334 = vpow2.f32 %v314_v25 }
 0x128   :  { %v196_v26 = vpop.f32.mrf.mxu1 }
 0x12b   :  { %v335_v27 = vpop.eup %334 }
 0x12c   :  { %v201_v28 = vadd.f32 1.0, %v335_v27 }
 0x12e   :  { %336 = vrcp.f32 %v201_v28  ;;  %v213_v32 = vand.u32 2147483648, %v201_v28  ;;  %v211_v34 = vand.u32 2147483647, %v201_v28  ;;  %vm207_vm1 = vweird.f32 %v201_v28 }
 0x130   :  { %v214_v36 = vor.u32 1.1754944e-38, %v213_v32  ;;  %vm212_vm3 = vcmp.eq.f32.partialorder %v211_v34, 8.507059e+37 }
 0x134   :  { %v337_v29 = vpop.eup %336 }
 0x135   :  { %v203_v30 = vmul.f32 %v337_v29, %v201_v28  ;;  %vm208_vm0 = vweird.f32 %v337_v29 }
 0x136   :  { %vm209_vm2 = vmor %vm207_vm1, %vm208_vm0 }
 0x137   :  { %v204_v31 = vsub.f32 1.0, %v203_v30 }
 0x139   :  { %v205_v33 = vmul.f32 %v337_v29, %v204_v31 }
 0x13b   :  { %v206_v35 = vadd.f32 %v337_v29, %v205_v33 }
 0x13d   :  { %v210_v37 = vsel %vm209_vm2, %v337_v29, %v206_v35 }
 0x13e   :  { %v215_v38 = vsel %vm212_vm3, %v214_v36, %v210_v37 }
 0x13f   :  { %v217_v39 = vmul.f32 %v215_v38, %v115_v19 }
 0x141   :  { %v218_v40 = vmul.f32 %v217_v39, %v217_v39 }
 0x143   :  { %219 = vadd.xlane.f32.xlu0 %v218_v40 }
 0x1b6   :  { %v220_v41 = vpop.xlane.xlu0 %219 }
 0x1b7   :  { %v221_v42 = vmax.f32 %v220_v41, 1e-24 }
 0x1b9   :  { %338 = vrsqrt.f32 %v221_v42  ;;  %vm228_vm5 = vweird.f32 %v221_v42 }
 0x1bf   :  { %v339_v43 = vpop.eup %338 }
 0x1c0   :  { %v223_v44 = vmul.f32 %v339_v43, %v221_v42  ;;  %vm229_vm4 = vweird.f32 %v339_v43 }
 0x1c1   :  { %vm230_vm6 = vmor %vm228_vm5, %vm229_vm4 }
 0x1c2   :  { %v224_v45 = vmul.f32 %v339_v43, %v223_v44 }
 0x1c4   :  { %v225_v46 = vmul.f32 0.5, %v224_v45 }
 0x1c6   :  { %v226_v47 = vsub.f32 1.5, %v225_v46 }
 0x1c8   :  { %v227_v48 = vmul.f32 %v339_v43, %v226_v47 }
 0x1ca   :  { %v231_v49 = vsel %vm230_vm6, %v339_v43, %v227_v48 }
 0x1cb   :  { %v232_v50 = vmul.f32 %v231_v49, %v217_v39 }
 0x1cd   :  { %233 = vst [vmem:[#allocation3] sm:$0xff] %v232_v50 }
 0x1ce   :  { %244 = dma.vmem_to_hbm [thread:$0]  %s240_s2, 128, %s242_s30, [#allocation4]  }
 0x1cf   :  { %364 = dma.done.wait [#allocation4], 128  }
 0x1d0   :  { %365 = vsyncadd [#allocation4], 4294967168 }
 0x1d1   :  { %249 = vsyncpa [#allocation4], 1 }

</bundles_post_ra>
